<compile_context>
chip_gen: v5e
topology: v5e:2x2
jax: 0.10.0
libtpu: 0.0.40
codegen_flags: <defaults>
</compile_context>

<pallas_src>
import functools

import jax
import jax.numpy as jnp
from jax.experimental import pallas as pl
from jax.experimental.pallas import tpu as pltpu


def fm_kernel(params_ref, xt_ref, o_ref, *, n, k, sub):
    # params_ref: (n + 1 + n*k,) f32 in SMEM, laid out [w(n), b(1), V(n*k) row-major]
    # xt_ref:     (n, rblk, 128) f32 in VMEM -- features on axis 0, batch dense
    #             across sublanes (axis 1) and lanes (axis 2)
    # o_ref:      (rblk, 128) f32 in VMEM    -- lane+sublane-dense output
    rblk = xt_ref.shape[1]
    nsub = rblk // sub

    bias = params_ref[n]

    @pl.loop(0, nsub)
    def _(s):
        r0 = pl.multiple_of(s * sub, sub)

        # Fused single pass over the n features: each (sub, 128) x chunk is
        # loaded once and feeds the linear part and both interaction sums.
        lin = jnp.full((sub, 128), bias, dtype=jnp.float32)
        x2v2 = jnp.zeros((sub, 128), dtype=jnp.float32)          # sum_f,j (v_fj x_f)^2
        xv = [jnp.zeros((sub, 128), dtype=jnp.float32) for _ in range(k)]

        for f in range(n):
            xrow = xt_ref[f, pl.ds(r0, sub), :]                   # (sub, 128)
            lin = lin + xrow * params_ref[f]
            for j in range(k):
                xvf = xrow * params_ref[n + 1 + f * k + j]
                xv[j] = xv[j] + xvf
                x2v2 = x2v2 + xvf * xvf

        # NOTE: reference computes 0.5 * sum(p2 - p1) (sign-flipped vs textbook
        # FM); reproduced exactly.
        tmp = x2v2
        for j in range(k):
            tmp = tmp - xv[j] * xv[j]

        o_ref[pl.ds(r0, sub), :] = (lin + 0.5 * tmp).astype(o_ref.dtype)


def _round_up(a, m):
    return ((a + m - 1) // m) * m


def fm_forward(x, weight, bias, V, *, max_rows_per_block=512, sub_rows=8):
    """x: (B, n) f32; weight: (1, n); bias: (1,); V: (n, k) -> (B, 1)."""
    B, n = x.shape
    k = V.shape[1]

    # Batch -> (rows, 128) layout.  Rows per grid step are a multiple of 8
    # (sublane-dense) and capped so double-buffered VMEM stays small on all chips.
    R = -(-B // 128)                                   # lanes-rows needed
    rblk = min(_round_up(R, sub_rows), max_rows_per_block)   # rows per grid step
    Rtot = _round_up(R, rblk)
    Bp = Rtot * 128
    grid = (Rtot // rblk,)

    # One-time preprocessing pass: features -> leading axis, batch dense across
    # sublanes+lanes.  Zero-padded batch slots are sliced off below.
    xt = jnp.zeros((n, Bp), jnp.float32).at[:, :B].set(x.astype(jnp.float32).T)
    xt = xt.reshape(n, Rtot, 128)

    # Pack all tiny parameters into one SMEM vector: [w(n), b(1), V(n*k)].
    params = jnp.concatenate(
        [weight.reshape(-1), bias.reshape(-1), V.reshape(-1)]
    ).astype(jnp.float32)

    kernel = functools.partial(fm_kernel, n=n, k=k, sub=sub_rows)

    out = pl.pallas_call(
        kernel,
        out_shape=jax.ShapeDtypeStruct((Rtot, 128), jnp.float32),
        grid=grid,
        in_specs=[
            pl.BlockSpec(memory_space=pltpu.MemorySpace.SMEM),      # packed params
            pl.BlockSpec((n, rblk, 128), lambda i: (0, i, 0)),      # x^T row block
        ],
        out_specs=pl.BlockSpec((rblk, 128), lambda i: (i, 0)),      # dense output
        compiler_params=pltpu.CompilerParams(
            dimension_semantics=("parallel",)),                     # v7x: 2 TCs
    )(params, xt)

    # Drop padded batch slots and restore the (B, 1) column layout.
    return out.reshape(-1)[:B].reshape(B, 1).astype(x.dtype)


def fm_reference(x, weight, bias, V):
    lin = x @ weight.T + bias
    p1 = (x @ V) ** 2
    p2 = (x * x) @ (V * V)
    return lin + 0.5 * jnp.sum(p2 - p1, axis=-1, keepdims=True)


if __name__ == "__main__":
    # Shapes match the module driver: FM_Layer(6, 1), x = randn(400, 6)
    B, n, k = 400, 6, 1

    key = jax.random.PRNGKey(0)
    kx, kw, kb, kv = jax.random.split(key, 4)

    x = jax.random.normal(kx, (B, n), dtype=jnp.float32)

    # nn.Linear(n, 1) default init: U(-1/sqrt(n), 1/sqrt(n))
    bound = 1.0 / (n ** 0.5)
    weight = jax.random.uniform(kw, (1, n), jnp.float32, -bound, bound)
    bias = jax.random.uniform(kb, (1,), jnp.float32, -bound, bound)
    # nn.init.uniform_(V, -0.1, 0.1)
    V = jax.random.uniform(kv, (n, k), jnp.float32, -0.1, 0.1)

    out = fm_forward(x, weight, bias, V)
    out = jax.block_until_ready(out)

    ref = fm_reference(x, weight, bias, V)
    assert out.shape == (B, 1)
    assert jnp.allclose(out, ref, atol=1e-5, rtol=1e-5), "mismatch vs reference"

    print("KERNEL_OK")
</pallas_src>

<mosaic_0001>
module attributes {stable_mosaic.version = 11 : i64} {
  func.func @fm_kernel(%arg0: i32, %arg1: memref<13xf32, #tpu.memory_space<smem>>, %arg2: memref<6x8x128xf32, #tpu.memory_space<vmem>>, %arg3: memref<8x128xf32, #tpu.memory_space<vmem>>) attributes {dimension_semantics = [#tpu.dimension_semantics<parallel>], iteration_bounds = array<i64: 1>, scalar_prefetch = 0 : i64, scratch_operands = 0 : i64, tpu.core_type = #tpu.core_type<tc>, window_params = [{transform_indices = @transform_0, window_bounds = array<i64: 13>}, {transform_indices = @transform_1, window_bounds = array<i64: 6, 8, 128>}, {transform_indices = @transform_2, window_bounds = array<i64: 8, 128>}]} {
    %c6 = arith.constant 6 : index
    %0 = memref.load %arg1[%c6] : memref<13xf32, #tpu.memory_space<smem>>
    %c0_i32 = arith.constant 0 : i32
    %c1_i32 = arith.constant 1 : i32
    %1 = arith.muli %c0_i32, %c1_i32 : i32
    %c0_i32_0 = arith.constant 0 : i32
    %2 = arith.addi %c0_i32_0, %1 : i32
    %c8_i32 = arith.constant 8 : i32
    %3 = arith.muli %2, %c8_i32 : i32
    %4 = tpu.assume_multiple %3, 8 : i32
    %5 = vector.broadcast %0 : f32 to vector<8x128xf32>
    %cst = arith.constant 0.000000e+00 : f32
    %6 = vector.broadcast %cst : f32 to vector<8x128xf32>
    %cst_1 = arith.constant 0.000000e+00 : f32
    %7 = vector.broadcast %cst_1 : f32 to vector<8x128xf32>
    %c0 = arith.constant 0 : index
    %8 = arith.index_cast %4 : i32 to index
    %c0_2 = arith.constant 0 : index
    %9 = vector.load %arg2[%c0, %8, %c0_2] : memref<6x8x128xf32, #tpu.memory_space<vmem>>, vector<1x8x128xf32>
    %10 = vector.shape_cast %9 : vector<1x8x128xf32> to vector<8x128xf32>
    %c0_3 = arith.constant 0 : index
    %11 = memref.load %arg1[%c0_3] : memref<13xf32, #tpu.memory_space<smem>>
    %12 = vector.broadcast %11 : f32 to vector<8x128xf32>
    %13 = arith.mulf %10, %12 : vector<8x128xf32>
    %14 = arith.addf %5, %13 : vector<8x128xf32>
    %c7 = arith.constant 7 : index
    %15 = memref.load %arg1[%c7] : memref<13xf32, #tpu.memory_space<smem>>
    %16 = vector.broadcast %15 : f32 to vector<8x128xf32>
    %17 = arith.mulf %10, %16 : vector<8x128xf32>
    %18 = arith.addf %7, %17 : vector<8x128xf32>
    %19 = arith.mulf %17, %17 : vector<8x128xf32>
    %20 = arith.addf %6, %19 : vector<8x128xf32>
    %c1 = arith.constant 1 : index
    %21 = arith.index_cast %4 : i32 to index
    %c0_4 = arith.constant 0 : index
    %22 = vector.load %arg2[%c1, %21, %c0_4] : memref<6x8x128xf32, #tpu.memory_space<vmem>>, vector<1x8x128xf32>
    %23 = vector.shape_cast %22 : vector<1x8x128xf32> to vector<8x128xf32>
    %c1_5 = arith.constant 1 : index
    %24 = memref.load %arg1[%c1_5] : memref<13xf32, #tpu.memory_space<smem>>
    %25 = vector.broadcast %24 : f32 to vector<8x128xf32>
    %26 = arith.mulf %23, %25 : vector<8x128xf32>
    %27 = arith.addf %14, %26 : vector<8x128xf32>
    %c8 = arith.constant 8 : index
    %28 = memref.load %arg1[%c8] : memref<13xf32, #tpu.memory_space<smem>>
    %29 = vector.broadcast %28 : f32 to vector<8x128xf32>
    %30 = arith.mulf %23, %29 : vector<8x128xf32>
    %31 = arith.addf %18, %30 : vector<8x128xf32>
    %32 = arith.mulf %30, %30 : vector<8x128xf32>
    %33 = arith.addf %20, %32 : vector<8x128xf32>
    %c2 = arith.constant 2 : index
    %34 = arith.index_cast %4 : i32 to index
    %c0_6 = arith.constant 0 : index
    %35 = vector.load %arg2[%c2, %34, %c0_6] : memref<6x8x128xf32, #tpu.memory_space<vmem>>, vector<1x8x128xf32>
    %36 = vector.shape_cast %35 : vector<1x8x128xf32> to vector<8x128xf32>
    %c2_7 = arith.constant 2 : index
    %37 = memref.load %arg1[%c2_7] : memref<13xf32, #tpu.memory_space<smem>>
    %38 = vector.broadcast %37 : f32 to vector<8x128xf32>
    %39 = arith.mulf %36, %38 : vector<8x128xf32>
    %40 = arith.addf %27, %39 : vector<8x128xf32>
    %c9 = arith.constant 9 : index
    %41 = memref.load %arg1[%c9] : memref<13xf32, #tpu.memory_space<smem>>
    %42 = vector.broadcast %41 : f32 to vector<8x128xf32>
    %43 = arith.mulf %36, %42 : vector<8x128xf32>
    %44 = arith.addf %31, %43 : vector<8x128xf32>
    %45 = arith.mulf %43, %43 : vector<8x128xf32>
    %46 = arith.addf %33, %45 : vector<8x128xf32>
    %c3 = arith.constant 3 : index
    %47 = arith.index_cast %4 : i32 to index
    %c0_8 = arith.constant 0 : index
    %48 = vector.load %arg2[%c3, %47, %c0_8] : memref<6x8x128xf32, #tpu.memory_space<vmem>>, vector<1x8x128xf32>
    %49 = vector.shape_cast %48 : vector<1x8x128xf32> to vector<8x128xf32>
    %c3_9 = arith.constant 3 : index
    %50 = memref.load %arg1[%c3_9] : memref<13xf32, #tpu.memory_space<smem>>
    %51 = vector.broadcast %50 : f32 to vector<8x128xf32>
    %52 = arith.mulf %49, %51 : vector<8x128xf32>
    %53 = arith.addf %40, %52 : vector<8x128xf32>
    %c10 = arith.constant 10 : index
    %54 = memref.load %arg1[%c10] : memref<13xf32, #tpu.memory_space<smem>>
    %55 = vector.broadcast %54 : f32 to vector<8x128xf32>
    %56 = arith.mulf %49, %55 : vector<8x128xf32>
    %57 = arith.addf %44, %56 : vector<8x128xf32>
    %58 = arith.mulf %56, %56 : vector<8x128xf32>
    %59 = arith.addf %46, %58 : vector<8x128xf32>
    %c4 = arith.constant 4 : index
    %60 = arith.index_cast %4 : i32 to index
    %c0_10 = arith.constant 0 : index
    %61 = vector.load %arg2[%c4, %60, %c0_10] : memref<6x8x128xf32, #tpu.memory_space<vmem>>, vector<1x8x128xf32>
    %62 = vector.shape_cast %61 : vector<1x8x128xf32> to vector<8x128xf32>
    %c4_11 = arith.constant 4 : index
    %63 = memref.load %arg1[%c4_11] : memref<13xf32, #tpu.memory_space<smem>>
    %64 = vector.broadcast %63 : f32 to vector<8x128xf32>
    %65 = arith.mulf %62, %64 : vector<8x128xf32>
    %66 = arith.addf %53, %65 : vector<8x128xf32>
    %c11 = arith.constant 11 : index
    %67 = memref.load %arg1[%c11] : memref<13xf32, #tpu.memory_space<smem>>
    %68 = vector.broadcast %67 : f32 to vector<8x128xf32>
    %69 = arith.mulf %62, %68 : vector<8x128xf32>
    %70 = arith.addf %57, %69 : vector<8x128xf32>
    %71 = arith.mulf %69, %69 : vector<8x128xf32>
    %72 = arith.addf %59, %71 : vector<8x128xf32>
    %c5 = arith.constant 5 : index
    %73 = arith.index_cast %4 : i32 to index
    %c0_12 = arith.constant 0 : index
    %74 = vector.load %arg2[%c5, %73, %c0_12] : memref<6x8x128xf32, #tpu.memory_space<vmem>>, vector<1x8x128xf32>
    %75 = vector.shape_cast %74 : vector<1x8x128xf32> to vector<8x128xf32>
    %c5_13 = arith.constant 5 : index
    %76 = memref.load %arg1[%c5_13] : memref<13xf32, #tpu.memory_space<smem>>
    %77 = vector.broadcast %76 : f32 to vector<8x128xf32>
    %78 = arith.mulf %75, %77 : vector<8x128xf32>
    %79 = arith.addf %66, %78 : vector<8x128xf32>
    %c12 = arith.constant 12 : index
    %80 = memref.load %arg1[%c12] : memref<13xf32, #tpu.memory_space<smem>>
    %81 = vector.broadcast %80 : f32 to vector<8x128xf32>
    %82 = arith.mulf %75, %81 : vector<8x128xf32>
    %83 = arith.addf %70, %82 : vector<8x128xf32>
    %84 = arith.mulf %82, %82 : vector<8x128xf32>
    %85 = arith.addf %72, %84 : vector<8x128xf32>
    %86 = arith.mulf %83, %83 : vector<8x128xf32>
    %87 = arith.subf %85, %86 : vector<8x128xf32>
    %cst_14 = arith.constant 5.000000e-01 : f32
    %88 = vector.broadcast %cst_14 : f32 to vector<8x128xf32>
    %89 = arith.mulf %88, %87 : vector<8x128xf32>
    %90 = arith.addf %79, %89 : vector<8x128xf32>
    %91 = arith.index_cast %4 : i32 to index
    %c0_15 = arith.constant 0 : index
    %92 = vector.load %arg3[%91, %c0_15] : memref<8x128xf32, #tpu.memory_space<vmem>>, vector<8x128xf32>
    tpu.vector_store %arg3[%91, %c0_15], %90 {strides = array<i32>} : memref<8x128xf32, #tpu.memory_space<vmem>>, vector<8x128xf32>,
    %c1_i32_16 = arith.constant 1 : i32
    return
  }
  func.func @transform_0(%arg0: i32) -> i32 {
    %c0_i32 = arith.constant 0 : i32
    %c0_i32_0 = arith.constant 0 : i32
    return %c0_i32 : i32
  }
  func.func @transform_1(%arg0: i32) -> (i32, i32, i32) {
    %c0_i32 = arith.constant 0 : i32
    %c0_i32_0 = arith.constant 0 : i32
    %c0_i32_1 = arith.constant 0 : i32
    return %c0_i32, %arg0, %c0_i32_0 : i32, i32, i32
  }
  func.func @transform_2(%arg0: i32) -> (i32, i32) {
    %c0_i32 = arith.constant 0 : i32
    %c0_i32_0 = arith.constant 0 : i32
    return %arg0, %c0_i32 : i32, i32
  }
}

</mosaic_0001>

<bundles_post_ra>
// kernel: tpu_custom_call.1
= control target key start
LH: loop header
LB: loop body
LE: loop exit
PB: predicated region body
PF: predicated region fallthrough
CT: control target
= control target key end

     0   :  { %7 = vsyncpa [#allocation5], 0  ;;  %s265_s0 = inlined_call_operand.hbm [shape: f32[13], index: 0, kind: input, shape index: {}]   ;;  %s266_s1 = inlined_call_operand.hbm [shape: f32[6,8,128], index: 1, kind: input, shape index: {}]   ;;  %s267_s2 = inlined_call_operand.hbm [shape: f32[8,128], index: 2, kind: output, shape index: {}]  }
   0x1   :  { %8 = vsyncpa [#allocation3], 0 }
   0x2   :  { %9 = vsyncpa [#allocation4], 0  ;;  %s15_s11 = sshll.u32 %s265_s0, 4  ;;  %s23_s14 = sshll.u32 %s266_s1, 4  ;;  %s16_s11 = int_to_ptr.hbm [resolvable:$true] %s15_s11  ;;  %s24_s14 = int_to_ptr.hbm [resolvable:$true] %s23_s14 }
   0x3   :  { %s230_s15 = smov [#allocation2]   ;;  %s231_s16 = smov [#allocation6]  }
   0x4   :  { %18 = dma.hbm_to_smem %s16_s11, 16, %s230_s15, [#allocation5]  }
   0x5   :  { %s25_s17 = sshll.u32 %s231_s16, 4  ;;  %s232_s18 = smov 128   ;;  %s26_s17 = int_to_ptr.vmem [resolvable:$true] %s25_s17 }
   0x6   :  { %s233_s19 = smov 8  }
   0x7   :  { %31 = dma.hbm_to_vmem [thread:$0]  %s24_s14, 768, %s26_s17, [#allocation3], %s232_s18, %s232_s18, %s233_s19  }
   0x8   :  { %224 = dma.done.wait [#allocation5], 16  }
   0x9   :  { %225 = vsyncadd [#allocation5], 4294967280 }
   0xa   :  { %226 = dma.done.wait [#allocation3], 768  }
   0xb   :  { %227 = vsyncadd [#allocation3], 4294966528 }
   0xc   :  { %40 = sfence }
   0xd   :  { %s147_s0 = sld [smem:[#allocation2 + $0x6]]  ;;  %v43_v0 = vld [vmem:[#allocation6] sm:$0xff]  ;;  %v56_v5 = vld [vmem:[#allocation6 + $0x8] sm:$0xff]  ;;  %v69_v11 = vld [vmem:[#allocation6 + $0x10] sm:$0xff]  ;;  %s234_s3 = smov [#allocation7]  }
   0xe   :  { %s44_s20 = sld [smem:[#allocation2]]  ;;  %v82_v18 = vld [vmem:[#allocation6 + $0x18] sm:$0xff]  ;;  %v95_v30 = vld [vmem:[#allocation6 + $0x20] sm:$0xff]  ;;  %v108_v33 = vld [vmem:[#allocation6 + $0x28] sm:$0xff]  ;;  %s129_s4 = sshll.u32 %s234_s3, 4  ;;  %s130_s4 = int_to_ptr.vmem [resolvable:$true] %s129_s4 }
   0xf   :  { %s148_s21 = sld [smem:[#allocation2 + $0x7]]  ;;  %s131_s7 = sshll.u32 %s267_s2, 4  ;;  %s132_s7 = int_to_ptr.hbm [resolvable:$true] %s131_s7 }
  0x10   :  { %s149_s22 = sld [smem:[#allocation2 + $0x1]] }
  0x11   :  { %s150_s23 = sld [smem:[#allocation2 + $0x8]] }
  0x12   :  { %s151_s1 = sld [smem:[#allocation2 + $0x2]] }
  0x13   :  { %s152_s24 = sld [smem:[#allocation2 + $0x9]]  ;;  %v42_v1 = vstv %s147_s0 }
  0x14   :  { %v45_v2 = vstv %s44_s20  ;;  %s153_s25 = sld [smem:[#allocation2 + $0x3]] }
  0x15   :  { %v46_v3 = vmul.f32 %v45_v2, %v43_v0  ;;  %v49_v4 = vstv %s148_s21  ;;  %s154_s26 = sld [smem:[#allocation2 + $0xa]] }
  0x16   :  { %v50_v6 = vmul.f32 %v49_v4, %v43_v0  ;;  %v58_v7 = vstv %s149_s22  ;;  %s256_s27 = sld [smem:[#allocation2 + $0x4]] }
  0x17   :  { %v47_v8 = vadd.f32 %v46_v3, %v42_v1  ;;  %v59_v9 = vmul.f32 %v58_v7, %v56_v5  ;;  %v62_v10 = vstv %s150_s23  ;;  %s156_s28 = sld [smem:[#allocation2 + $0xb]] }
  0x18   :  { %v52_v12 = vmul.f32 %v50_v6, %v50_v6  ;;  %v63_v13 = vmul.f32 %v62_v10, %v56_v5  ;;  %v71_v14 = vstv %s151_s1  ;;  %s258_s29 = sld [smem:[#allocation2 + $0x5]] }
  0x19   :  { %v60_v15 = vadd.f32 %v59_v9, %v47_v8  ;;  %v72_v16 = vmul.f32 %v71_v14, %v69_v11  ;;  %v75_v17 = vstv %s152_s24  ;;  %s158_s30 = sld [smem:[#allocation2 + $0xc]] }
  0x1a   :  { %v64_v19 = vadd.f32 %v63_v13, %v50_v6  ;;  %v65_v20 = vmul.f32 %v63_v13, %v63_v13  ;;  %v76_v21 = vmul.f32 %v75_v17, %v69_v11  ;;  %v84_v22 = vstv %s153_s25 }
  0x1b   :  { %v73_v23 = vadd.f32 %v72_v16, %v60_v15  ;;  %v85_v24 = vmul.f32 %v84_v22, %v82_v18  ;;  %v88_v25 = vstv %s154_s26 }
  0x1c   :  { %v66_v26 = vadd.f32 %v65_v20, %v52_v12  ;;  %v77_v27 = vadd.f32 %v76_v21, %v64_v19  ;;  %v78_v28 = vmul.f32 %v76_v21, %v76_v21  ;;  %v89_v29 = vmul.f32 %v88_v25, %v82_v18 }
  0x1d   :  { %v97_v31 = vstv %s256_s27  ;;  %v101_v32 = vstv %s156_s28  ;;  %v86_v37 = vadd.f32 %v85_v24, %v73_v23 }
  0x1e   :  { %v79_v34 = vadd.f32 %v78_v28, %v66_v26  ;;  %v90_v35 = vadd.f32 %v89_v29, %v77_v27  ;;  %v91_v36 = vmul.f32 %v89_v29, %v89_v29  ;;  %v98_v38 = vmul.f32 %v97_v31, %v95_v30 }
  0x1f   :  { %v102_v39 = vmul.f32 %v101_v32, %v95_v30  ;;  %v114_v40 = vstv %s158_s30  ;;  %v110_v42 = vstv %s258_s29 }
  0x20   :  { %v92_v41 = vadd.f32 %v91_v36, %v79_v34  ;;  %v115_v43 = vmul.f32 %v114_v40, %v108_v33  ;;  %v99_v47 = vadd.f32 %v98_v38, %v86_v37  ;;  %v111_v49 = vmul.f32 %v110_v42, %v108_v33 }
  0x21   :  { %v103_v44 = vadd.f32 %v102_v39, %v90_v35  ;;  %v104_v45 = vmul.f32 %v102_v39, %v102_v39 }
  0x22   :  { %v117_v46 = vmul.f32 %v115_v43, %v115_v43  ;;  %v112_v53 = vadd.f32 %v111_v49, %v99_v47 }
  0x23   :  { %v105_v48 = vadd.f32 %v104_v45, %v92_v41  ;;  %v116_v50 = vadd.f32 %v115_v43, %v103_v44 }
  0x25   :  { %v118_v51 = vadd.f32 %v117_v46, %v105_v48  ;;  %v119_v52 = vmul.f32 %v116_v50, %v116_v50 }
  0x27   :  { %v120_v54 = vsub.f32 %v118_v51, %v119_v52 }
  0x29   :  { %v121_v55 = vmul.f32 0.5, %v120_v54 }
  0x2b   :  { %v122_v56 = vadd.f32 %v121_v55, %v112_v53 }
  0x2d   :  { %123 = vst [vmem:[#allocation7] sm:$0xff] %v122_v56 }
  0x2e   :  { %134 = dma.vmem_to_hbm [thread:$0]  %s130_s4, 128, %s132_s7, [#allocation4]  }
  0x2f   :  { %228 = dma.done.wait [#allocation4], 128  }
  0x30   :  { %229 = vsyncadd [#allocation4], 4294967168 }
  0x31   :  { %139 = vsyncpa [#allocation3], 1 }
  0x32   :  { %140 = vsyncpa [#allocation4], 1 }
  0x33   :  { %141 = vsyncpa [#allocation5], 1 }

</bundles_post_ra>
